<compile_context>
chip_gen: v7x
topology: tpu7x:2x2x1
jax: 0.10.0
libtpu: 0.0.40
codegen_flags: <defaults>
</compile_context>

<pallas_src>
import math

import jax
import jax.numpy as jnp
from jax.experimental import pallas as pl
from jax.experimental.pallas import tpu as pltpu


def _embed_kernel(x_ref, halo_ref, w_ref, b_ref, o_ref):
    """One (batch, L-tile) grid step.

    x_ref:    (1, TL, C)    current L-tile of the input (compute dtype)
    halo_ref: (1, 1, 2, C)  circular halo rows [x[(t0-1)%L], x[(t0+TL)%L]]
    w_ref:    (3, C, N)     conv taps, VMEM-resident across the grid
    b_ref:    (1, N)        bias (f32), VMEM-resident
    o_ref:    (1, TL, N)    output tile (f32)
    """
    x = x_ref[0]                      # (TL, C)
    halo = halo_ref[0, 0]             # (2, C)
    prev = halo[0:1, :]               # x[(t0 - 1) % L]  (per-batch circular)
    nxt = halo[1:2, :]                # x[(t0 + TL) % L]

    # Shift-by-one copies of the tile; the wrap rows come from the halo.
    x_m1 = jnp.concatenate([prev, x[:-1, :]], axis=0)    # x[t-1]
    x_p1 = jnp.concatenate([x[1:, :], nxt], axis=0)      # x[t+1]

    # out[t] = x[t-1] @ W0 + x[t] @ W1 + x[t+1] @ W2 + bias  (f32 accumulate)
    acc = jnp.dot(x_m1, w_ref[0], preferred_element_type=jnp.float32)
    acc = acc + jnp.dot(x, w_ref[1], preferred_element_type=jnp.float32)
    acc = acc + jnp.dot(x_p1, w_ref[2], preferred_element_type=jnp.float32)

    # Epilogue stays f32 (v5e VPU has no bf16); cast only at the final store.
    o_ref[0] = (acc + b_ref[...]).astype(o_ref.dtype)


def _pick_tile_l(L, max_tile=1024):
    """Largest multiple-of-8 divisor of L that is <= max_tile; else whole L.

    A full-extent (TL == L) block is always legal; a proper tile must be a
    multiple of 8 (TPU sublane rule) and divide L exactly so the circular
    halo logic never sees a partial tile.
    """
    for cand in range(min(L, max_tile), 7, -1):
        if cand % 8 == 0 and L % cand == 0:
            return cand
    return L


def token_embedding(x, weight, bias, *, compute_dtype=jnp.bfloat16, tile_l=None):
    """x: (B, L, c_in); weight: (dim_model, c_in, 3); bias: (dim_model,).

    Returns (B, L, dim_model) float32.
    """
    B, L, C = x.shape
    N = weight.shape[0]

    TL = _pick_tile_l(L) if tile_l is None else tile_l
    assert L % TL == 0, f"tile_l={TL} must divide L={L}"
    assert TL == L or TL % 8 == 0, f"tile_l={TL} must be a multiple of 8 (or == L)"
    n_lt = L // TL

    xc = x.astype(compute_dtype)
    # (dim_model, c_in, 3) -> (3, c_in, dim_model): w[k] is the tap-k matrix.
    w = jnp.transpose(weight, (2, 1, 0)).astype(compute_dtype)
    b2d = bias.reshape(1, N).astype(jnp.float32)

    # Per-(batch, tile) circular halo rows: x[(t0-1) % L] and x[(t0+TL) % L].
    # Tiny gather (B * n_lt * 2 * C elements) instead of a 3x-wide HBM copy.
    starts = jnp.arange(n_lt, dtype=jnp.int32) * TL
    halo_idx = jnp.stack([(starts - 1) % L, (starts + TL) % L], axis=1)  # (n_lt, 2)
    halo = xc[:, halo_idx, :]                                            # (B, n_lt, 2, C)

    out = pl.pallas_call(
        _embed_kernel,
        out_shape=jax.ShapeDtypeStruct((B, L, N), jnp.float32),
        grid=(B, n_lt),
        in_specs=[
            # x tile: streamed / double-buffered across the grid.
            pl.BlockSpec((1, TL, C), lambda bi, li: (bi, li, 0)),
            # halo rows for this (batch, tile).
            pl.BlockSpec((1, 1, 2, C), lambda bi, li: (bi, li, 0, 0)),
            # weight + bias: constant index_map -> DMA'd once, VMEM-resident.
            pl.BlockSpec((3, C, N), lambda bi, li: (0, 0, 0)),
            pl.BlockSpec((1, N), lambda bi, li: (0, 0)),
        ],
        out_specs=pl.BlockSpec((1, TL, N), lambda bi, li: (bi, li, 0)),
        compiler_params=pltpu.CompilerParams(
            dimension_semantics=("parallel", "parallel")),
    )(xc, halo, w, b2d)

    return out


def _reference(x, weight, bias):
    """Pure-JAX reference of the circular conv embedding (for correctness)."""
    x_m1 = jnp.roll(x, shift=1, axis=1)
    x_p1 = jnp.roll(x, shift=-1, axis=1)
    out = (jnp.einsum('blc,nc->bln', x_m1, weight[:, :, 0]) +
           jnp.einsum('blc,nc->bln', x, weight[:, :, 1]) +
           jnp.einsum('blc,nc->bln', x_p1, weight[:, :, 2]))
    return out + bias[None, None, :]


if __name__ == "__main__":
    B, L, C_IN, DIM = 2, 16, 8, 32

    key = jax.random.PRNGKey(0)
    kx, kw, kb = jax.random.split(key, 3)

    x = jax.random.normal(kx, (B, L, C_IN), dtype=jnp.float32)

    # Deterministic kaiming_normal_(mode='fan_in', nonlinearity='leaky_relu'):
    # torch default negative_slope a=0.01 -> gain = sqrt(2 / (1 + a^2)),
    # fan_in = c_in * kernel_size, std = gain / sqrt(fan_in).
    fan_in = C_IN * 3
    gain = math.sqrt(2.0 / (1.0 + 0.01 ** 2))
    std = gain / math.sqrt(fan_in)
    weight = std * jax.random.normal(kw, (DIM, C_IN, 3), dtype=jnp.float32)

    # torch Conv1d default bias init: U(-1/sqrt(fan_in), 1/sqrt(fan_in)).
    bound = 1.0 / math.sqrt(fan_in)
    bias = jax.random.uniform(kb, (DIM,), dtype=jnp.float32,
                              minval=-bound, maxval=bound)

    ref = _reference(x, weight, bias)

    # 1) f32 path, explicitly tiled over L (exercises the circular-halo logic),
    #    tight tolerance vs. the reference.
    out_f32 = token_embedding(x, weight, bias,
                              compute_dtype=jnp.float32, tile_l=8)
    out_f32 = jax.block_until_ready(out_f32)
    assert out_f32.shape == (B, L, DIM), out_f32.shape
    assert jnp.allclose(out_f32, ref, atol=1e-5, rtol=1e-5), "f32 mismatch"

    # 2) Default path: bf16 operands, f32 accumulation (looser tolerance).
    out_bf16 = token_embedding(x, weight, bias)
    out_bf16 = jax.block_until_ready(out_bf16)
    assert out_bf16.shape == (B, L, DIM), out_bf16.shape
    assert jnp.allclose(out_bf16, ref, atol=1e-1, rtol=5e-2), "bf16 mismatch"

    # TODO(synk): the PyTorch forward's debug print('conv embed shape', ...) is
    # intentionally omitted (host-side side effect, no kernel equivalent needed).
    print("KERNEL_OK")
</pallas_src>

<mosaic_0001>
module attributes {stable_mosaic.version = 11 : i64} {
  func.func @_embed_kernel(%arg0: i32, %arg1: i32, %arg2: memref<1x8x8xf32, #tpu.memory_space<vmem>>, %arg3: memref<1x1x2x8xf32, #tpu.memory_space<vmem>>, %arg4: memref<3x8x32xf32, #tpu.memory_space<vmem>>, %arg5: memref<1x32xf32, #tpu.memory_space<vmem>>, %arg6: memref<1x8x32xf32, #tpu.memory_space<vmem>>) attributes {dimension_semantics = [#tpu.dimension_semantics<parallel>, #tpu.dimension_semantics<parallel>], iteration_bounds = array<i64: 2, 2>, scalar_prefetch = 0 : i64, scratch_operands = 0 : i64, tpu.core_type = #tpu.core_type<tc>, window_params = [{transform_indices = @transform_0, window_bounds = array<i64: 1, 8, 8>}, {transform_indices = @transform_1, window_bounds = array<i64: 1, 1, 2, 8>}, {pipeline_mode = #tpu.pipeline_mode<synchronous>, transform_indices = @transform_2, window_bounds = array<i64: 3, 8, 32>}, {pipeline_mode = #tpu.pipeline_mode<synchronous>, transform_indices = @transform_3, window_bounds = array<i64: 1, 32>}, {transform_indices = @transform_4, window_bounds = array<i64: 1, 8, 32>}]} {
    %c0 = arith.constant 0 : index
    %c0_0 = arith.constant 0 : index
    %c0_1 = arith.constant 0 : index
    %0 = vector.load %arg2[%c0, %c0_0, %c0_1] : memref<1x8x8xf32, #tpu.memory_space<vmem>>, vector<1x8x8xf32>
    %1 = vector.shape_cast %0 : vector<1x8x8xf32> to vector<8x8xf32>
    %c0_2 = arith.constant 0 : index
    %c0_3 = arith.constant 0 : index
    %c0_4 = arith.constant 0 : index
    %c0_5 = arith.constant 0 : index
    %2 = vector.load %arg3[%c0_2, %c0_3, %c0_4, %c0_5] : memref<1x1x2x8xf32, #tpu.memory_space<vmem>>, vector<1x1x2x8xf32>
    %3 = vector.shape_cast %2 : vector<1x1x2x8xf32> to vector<2x8xf32>
    %4 = vector.extract_strided_slice %3 {offsets = [0, 0], sizes = [1, 8], strides = [1, 1]} : vector<2x8xf32> to vector<1x8xf32>
    %5 = vector.extract_strided_slice %3 {offsets = [1, 0], sizes = [1, 8], strides = [1, 1]} : vector<2x8xf32> to vector<1x8xf32>
    %6 = vector.extract_strided_slice %1 {offsets = [0, 0], sizes = [7, 8], strides = [1, 1]} : vector<8x8xf32> to vector<7x8xf32>
    %7 = tpu.concatenate %4, %6 in 0 : vector<1x8xf32>, vector<7x8xf32> -> vector<8x8xf32>
    %8 = vector.extract_strided_slice %1 {offsets = [1, 0], sizes = [7, 8], strides = [1, 1]} : vector<8x8xf32> to vector<7x8xf32>
    %9 = tpu.concatenate %8, %5 in 0 : vector<7x8xf32>, vector<1x8xf32> -> vector<8x8xf32>
    %c0_6 = arith.constant 0 : index
    %c0_7 = arith.constant 0 : index
    %c0_8 = arith.constant 0 : index
    %10 = vector.load %arg4[%c0_6, %c0_7, %c0_8] : memref<3x8x32xf32, #tpu.memory_space<vmem>>, vector<1x8x32xf32>
    %11 = vector.shape_cast %10 : vector<1x8x32xf32> to vector<8x32xf32>
    %cst = arith.constant dense<0.000000e+00> : vector<8x32xf32>
    %12 = tpu.matmul %7, %11, %cst {dimension_numbers = #tpu.dot_dimension_numbers<[1], [0], [0], [1], [0, 0, 1, 1], [], []>} : vector<8x8xf32>, vector<8x32xf32>, vector<8x32xf32> -> vector<8x32xf32>
    %c1 = arith.constant 1 : index
    %c0_9 = arith.constant 0 : index
    %c0_10 = arith.constant 0 : index
    %13 = vector.load %arg4[%c1, %c0_9, %c0_10] : memref<3x8x32xf32, #tpu.memory_space<vmem>>, vector<1x8x32xf32>
    %14 = vector.shape_cast %13 : vector<1x8x32xf32> to vector<8x32xf32>
    %cst_11 = arith.constant dense<0.000000e+00> : vector<8x32xf32>
    %15 = tpu.matmul %1, %14, %cst_11 {dimension_numbers = #tpu.dot_dimension_numbers<[1], [0], [0], [1], [0, 0, 1, 1], [], []>} : vector<8x8xf32>, vector<8x32xf32>, vector<8x32xf32> -> vector<8x32xf32>
    %16 = arith.addf %12, %15 : vector<8x32xf32>
    %c2 = arith.constant 2 : index
    %c0_12 = arith.constant 0 : index
    %c0_13 = arith.constant 0 : index
    %17 = vector.load %arg4[%c2, %c0_12, %c0_13] : memref<3x8x32xf32, #tpu.memory_space<vmem>>, vector<1x8x32xf32>
    %18 = vector.shape_cast %17 : vector<1x8x32xf32> to vector<8x32xf32>
    %cst_14 = arith.constant dense<0.000000e+00> : vector<8x32xf32>
    %19 = tpu.matmul %9, %18, %cst_14 {dimension_numbers = #tpu.dot_dimension_numbers<[1], [0], [0], [1], [0, 0, 1, 1], [], []>} : vector<8x8xf32>, vector<8x32xf32>, vector<8x32xf32> -> vector<8x32xf32>
    %20 = arith.addf %16, %19 : vector<8x32xf32>
    %c0_15 = arith.constant 0 : index
    %c0_16 = arith.constant 0 : index
    %21 = vector.load %arg5[%c0_15, %c0_16] : memref<1x32xf32, #tpu.memory_space<vmem>>, vector<1x32xf32>
    %22 = vector.broadcast %21 : vector<1x32xf32> to vector<8x32xf32>
    %23 = arith.addf %20, %22 : vector<8x32xf32>
    %c0_17 = arith.constant 0 : index
    %c0_18 = arith.constant 0 : index
    %c0_19 = arith.constant 0 : index
    %24 = vector.load %arg6[%c0_17, %c0_18, %c0_19] : memref<1x8x32xf32, #tpu.memory_space<vmem>>, vector<1x8x32xf32>
    %25 = vector.shape_cast %24 : vector<1x8x32xf32> to vector<8x32xf32>
    %26 = vector.shape_cast %23 : vector<8x32xf32> to vector<1x8x32xf32>
    tpu.vector_store %arg6[%c0_17, %c0_18, %c0_19], %26 {strides = array<i32>} : memref<1x8x32xf32, #tpu.memory_space<vmem>>, vector<1x8x32xf32>,
    return
  }
  func.func @transform_0(%arg0: i32, %arg1: i32) -> (i32, i32, i32) {
    %c0_i32 = arith.constant 0 : i32
    %c0_i32_0 = arith.constant 0 : i32
    return %arg0, %arg1, %c0_i32 : i32, i32, i32
  }
  func.func @transform_1(%arg0: i32, %arg1: i32) -> (i32, i32, i32, i32) {
    %c0_i32 = arith.constant 0 : i32
    %c0_i32_0 = arith.constant 0 : i32
    %c0_i32_1 = arith.constant 0 : i32
    return %arg0, %arg1, %c0_i32, %c0_i32_0 : i32, i32, i32, i32
  }
  func.func @transform_2(%arg0: i32, %arg1: i32) -> (i32, i32, i32) {
    %c0_i32 = arith.constant 0 : i32
    %c0_i32_0 = arith.constant 0 : i32
    %c0_i32_1 = arith.constant 0 : i32
    %c0_i32_2 = arith.constant 0 : i32
    return %c0_i32, %c0_i32_0, %c0_i32_1 : i32, i32, i32
  }
  func.func @transform_3(%arg0: i32, %arg1: i32) -> (i32, i32) {
    %c0_i32 = arith.constant 0 : i32
    %c0_i32_0 = arith.constant 0 : i32
    %c0_i32_1 = arith.constant 0 : i32
    return %c0_i32, %c0_i32_0 : i32, i32
  }
  func.func @transform_4(%arg0: i32, %arg1: i32) -> (i32, i32, i32) {
    %c0_i32 = arith.constant 0 : i32
    %c0_i32_0 = arith.constant 0 : i32
    return %arg0, %arg1, %c0_i32 : i32, i32, i32
  }
}

</mosaic_0001>

<bundles_post_ra>
// kernel: tpu_custom_call.1
= control target key start
LH: loop header
LB: loop body
LE: loop exit
PB: predicated region body
PF: predicated region fallthrough
CT: control target
= control target key end

     0   :  { %9 = vsyncpa [#allocation3], 0  ;;  %s1010_s0 = inlined_call_operand.vmem [shape: f32[2,16,8], index: 0, kind: input, shape index: {}]   ;;  %s1011_s1 = inlined_call_operand.vmem [shape: f32[2,2,2,8], index: 1, kind: input, shape index: {}]   ;;  %s1012_s2 = inlined_call_operand.vmem [shape: f32[3,8,32], index: 2, kind: input, shape index: {}]   ;;  %s1013_s3 = inlined_call_operand.vmem [shape: f32[1,32], index: 3, kind: input, shape index: {}]   ;;  %s1014_s4 = inlined_call_operand.hbm [shape: f32[2,16,32], index: 4, kind: output, shape index: {}]  }
   0x1   :  { %11 = vsyncpa [#allocation3 + $0x1], 0  ;;  %s852_s15 = smov 0   ;;  %s854_s16 = smov 0  }
   0x2   :  { %s856_s17 = smov 0   ;;  %s858_s18 = smov 0  }
   0x3   :  { %s860_s19 = smov 0   ;;  %s862_s20 = smov 0  }
   0x4   :  { %s864_s21 = smov 0   ;;  %s866_s22 = smov 0  }
   0x5 LB: > { %s613_s23 = sadd.s32 4294967295, %s822_s22   ;;  %s614_s24 = sadd.s32 4294967294, %s822_s22   ;;  %s822_s22 = sphi %s866_s22, %s17_s22   ;;  %s818_s21 = sphi %s864_s21, %s1026_s21   ;;  %s814_s20 = sphi %s862_s20, %s1025_s20   ;;  %s810_s19 = sphi %s860_s19, %s1024_s19   ;;  %s806_s18 = sphi %s858_s18, %s1023_s18   ;;  %s802_s17 = sphi %s856_s17, %s1022_s17   ;;  %s798_s16 = sphi %s854_s16, %s1021_s16   ;;  %s794_s15 = sphi %s852_s15, %s1020_s15  }
   0x6   : > { %s26_s25 = sadd.s32 1, %s814_s20  ;;  %s29_s26 = sadd.s32 1, %s818_s21 }
   0x7   : > { %p27_p0 = scmp.ge.s32.totalorder %s26_s25, 2  ;;  %p146_p1 = scmp.ne.s32.totalorder %s802_s17, %s798_s16 }
   0x8   : > { %p147_p2 = scmp.eq.s32.totalorder %s613_s23, 3  ;;  %p152_p5 = scmp.ne.s32.totalorder %s798_s16, %s794_s15 }
   0x9   : > { %s1028_s25 = smov (%p27_p0, %s26_s25), 0  ;;  %s1030_s26 = smov (!%p27_p0, %s29_s26), %s818_s21 }
   0xa   : > { %s132_s27 = ssub.s32 %s814_s20, %s1028_s25  ;;  %p903_p3 = por %p147_p2, %p146_p1 }
   0xb   : > { %p31_p4 = scmp.ge.s32.totalorder %s1030_s26, 2  ;;  %p153_p6 = scmp.eq.s32.totalorder %s614_s24, 3 }
   0xc   : > { %p617_p7 = scmp.ge.s32.totalorder %s822_s22, 1  ;;  %p199_p9 = scmp.lt.s32.totalorder %s822_s22, 5 }
   0xd   : > { %s1032_s26 = smov (%p31_p4, %s1030_s26), 0  ;;  %p912_p8 = por %p153_p6, %p152_p5 }
   0xe   : > { %1017 = sst [smem:[#allocation5_spill]] %s1032_s26  ;;  %s131_s30 = ssub.s32 %s818_s21, %s1032_s26 }
   0xf   : > { %s136_s5 = sadd.s32 1, %s802_s17  ;;  %s133_s6 = sor.u32 %s132_s27, %s131_s30 }
  0x10   : > { %p200_p10 = pnand %p617_p7, %p199_p9  ;;  %p134_p11 = scmp.eq.s32.totalorder %s133_s6, 0 }
  0x11   : > { %v623_v0 = vld [vmem:[%s1012_s2 + $0x8] sm:$0xff] (!%p200_p10)  ;;  %p236_p12 = scmp.lt.s32.totalorder (!%p200_p10), %s810_s19, 1  ;;  %p238_p13 = scmp.lt.s32.totalorder (!%p200_p10), %s806_s18, 1  ;;  %v824_v1 = vmov (!%p200_p10), 0.0   ;;  %vm825_vm0 = vmmov (!%p200_p10), 0   ;;  %v266_v2 = vld [vmem:[%s1012_s2] sm:$0xff] (!%p200_p10) }
  0x12   : > { %s921_s7 = scalar_select %p134_p11, %s802_s17, %s136_s5  }
  0x13   : > { %203 = sbr.rel (%p200_p10) target bundleno = 268 (0x10c), region = 36  ;;  %640 = vmatprep.subr.mxu0 (!%p200_p10), %v824_v1  ;;  %642 = vmatprep.mubr.msk.f32.mxu0 (!%p200_p10), %vm825_vm0, %v824_v1  ;;  %vm269_vm1 = vcmask (!%p200_p10), 64512   ;;  %v626_v3 = vld [vmem:[%s1012_s2 + $0x10] sm:$0xff] (!%p200_p10)  ;;  %vm257_vm2 = vcmask (!%p200_p10), 1040384   ;;  %vm264_vm3 = vcmask (!%p200_p10), 1046528   ;;  %vm499_vm4 = vcmask (!%p200_p10), 261120  }
  0x14   : > { %641 = vmatpush3.msra.mxu0 (!%p200_p10), %v623_v0  ;;  %645 = vmatprep.subr.mxu1 (!%p200_p10), %v824_v1  ;;  %v628_v17 = vld [vmem:[%s1013_s3] ss:$0 sm:$0xff] (!%p200_p10)  ;;  %s826_s10 = smov (!%p200_p10), [#allocation2]  }
  0x15   : > { %650 = vmatprep.subr.mxu0 (!%p200_p10), %v824_v1  ;;  %646 = vmatpush3.msra.mxu1 (!%p200_p10), %v266_v2  ;;  %s732_s11 = sshll.u32 (!%p200_p10), %s826_s10, 4  ;;  %s733_s11 = int_to_ptr.vmem [resolvable:$false] %s732_s11 }
  0x16   : > { %647 = vmatprep.mubr.msk.f32.mxu1 (!%p200_p10), %vm825_vm0, %v824_v1 }
  0x1a   : > { %s237_s12 = scalar_select %p236_p12, %s810_s19, 1 }
  0x1b   : > { %s239_s13 = scalar_select %p238_p13, %s806_s18, 1 }
  0x1c   : > { %s619_s14 = sshll.u32 %s237_s12, 1  ;;  %s233_s12 = sand.u32 1, %s798_s16  }
  0x1d   : > { %s241_s23 = sadd.s32 %s619_s14, %s239_s13  ;;  %s618_s13 = sshll.u32 %s233_s12, 3 }
  0x1e   : > { %s620_s24 = sshll.u32 %s241_s23, 3  ;;  %s622_s27 = sshll.u32 %s241_s23, 1 }
  0x1f   : > { %s243_s6 = scalar_lea.vmem %s1010_s0, %s620_s24  ;;  %s251_s26 = scalar_lea.vmem %s1011_s1, %s622_s27 }
  0x20   : > { %v252_v4 = vld [vmem:[%s243_s6] sm:$0xff]  ;;  %s235_s30 = scalar_lea.vmem [#allocation2], %s618_s13  ;;  %s502_s8 = scalar_lea.sflag [#allocation3], %s233_s12 }
  0x21   : > { %v253_v5 = vld [vmem:[%s251_s26] sm:$0x3]  ;;  %v255_v6 = vrot.slane %v252_v4, 7  ;;  %v259_v7 = vrot.slane %v252_v4, 1  ;;  %643 = vmatmul.mubr.msk.f32.vlgmr.msra.gmra.mrb[0].mxu0 %vm269_vm1, %v252_v4  ;;  %s630_s26 = sshll.u32 %s810_s19, 1  ;;  %s517_s5 = sshll.u32 %s235_s30, 4  ;;  %s959_s5 = int_to_ptr.vmem [resolvable:$true] %s517_s5 }
  0x22   : > { %v262_v8 = vrot.slane %v253_v5, 2  ;;  %651 = vmatpush3.msra.mxu0 %v626_v3  ;;  %652 = vmatprep.mubr.msk.f32.mxu0 %vm825_vm0, %v824_v1  ;;  %s513_s14 = sadd.s32 %s806_s18, %s630_s26  ;;  %s728_s9 = scalar_lea.vmem %s959_s5, 128 }
  0x23   : > { %v258_v9 = vsel %vm257_vm2, %v253_v5, %v255_v6  ;;  %s631_s27 = sshll.u32 %s513_s14, 7  ;;  %p729_p0 = scmp.ne.s32.totalorder %s959_s5, %s728_s9 }
  0x24   : > { %v265_v10 = vsel %vm264_vm3, %v259_v7, %v262_v8  ;;  %648 = vmatmul.mubr.msk.f32.vlgmr.msra.gmra.mrb[0].mxu1 %vm269_vm1, %v258_v9  ;;  %s957_s18 = scalar_lea.hbm %s1014_s4, %s631_s27  ;;  %s734_s13 = scalar_lea.vmem %s733_s11, 256 }
  0x25   : > { %653 = vmatmul.mubr.msk.f32.vlgmr.msra.gmra.mrb[2].mxu0 %vm269_vm1, %v265_v10  ;;  %p730_p1 = pnand %p729_p0, %p903_p3  ;;  %p735_p4 = scmp.lt.s32.totalorder %s959_s5, %s733_s11 }
  0x26   : > { %p736_p5 = scmp.lt.s32.totalorder %s734_s13, %s728_s9 }
  0x27   : > { %p731_p2 = pneg %p730_p1 }
  0x28   : > { %p737_p6 = por %p736_p5, %p735_p4 }
  0x2a   : > { %p738_p7 = pnand %p737_p6, %p731_p2 }
  0xf4   : > { %v338_v11 = vpop.f32.mrb[0].mxu0 }
  0xf5   : > { %v644_v12 = vpop.f32.mrb[1].mxu0 }
  0xf7   : > { %v411_v13 = vpop.f32.mrb[0].mxu1 }
  0xf8   : > { %v412_v14 = vadd.f32 %v411_v13, %v338_v11  ;;  %v649_v15 = vpop.f32.mrb[1].mxu1  ;;  %v486_v16 = vpop.f32.mrb[2].mxu0 }
  0xf9   : > { %v654_v18 = vpop.f32.mrb[3].mxu0 }
  0xfa   : > { %v490_v19 = vadd.f32 %v486_v16, %v412_v14 }
  0xfc   : > { %v498_v20 = vadd.f32 %v628_v17, %v490_v19 }
  0xfe   : > { %500 = vst.msk [vmem:[%s235_s30] sm:$0xff] %vm499_vm4, %v498_v20 }
  0xff   : > { %741 = shalt.err (!%p738_p7)
}
 0x100   : > { %s742_s12 = scalar_lea.hbm %s957_s18, 128  ;;  %s746_s23 = scalar_lea.hbm %s1014_s4, 512 }
 0x101   : > { %p743_p9 = scmp.ne.s32.totalorder %s957_s18, %s742_s12  ;;  %p747_p12 = scmp.lt.u32.totalorder %s957_s18, %s1014_s4 }
 0x102   : > { %p748_p13 = scmp.lt.u32.totalorder %s746_s23, %s742_s12  ;;  %p750_p1 = scmp.lt.u32.totalorder %s742_s12, %s957_s18 }
 0x103   : > { %p744_p10 = pnand %p743_p9, %p903_p3 }
 0x104   : > { %p749_p0 = por %p748_p13, %p747_p12 }
 0x105   : > { %p745_p11 = pneg %p744_p10 }
 0x106   : > { %p751_p2 = por %p750_p1, %p749_p0 }
 0x108   : > { %p752_p4 = pnand %p751_p2, %p745_p11 }
 0x10a   : > { %755 = shalt.err (!%p752_p4)
}
 0x10b   : > { %655 = dma.vmem_to_hbm [thread:$0]  (%p903_p3), %s959_s5, 128, %s957_s18, %s502_s8  }
 0x10c PF: > { %p661_p5 = scmp.ge.s32.totalorder %s822_s22, 2  ;;  %s529_s30 = sand.u32 1, %s794_s15  }
 0x10d   : > { %s530_s19 = scalar_lea.sflag [#allocation3], %s529_s30 }
 0x10e   : > { %p658_p6 = pnand %p661_p5, %p912_p8 }
 0x110   : > { %789 = dma.done.wait (!%p658_p6), %s530_s19, 128  }
 0x111   : > { %791 = vsyncadd (!%p658_p6), %s530_s19, 4294967168  ;;  %s17_s22 = sadd.s32 1, %s822_s22   ;;  %s1019_s28 = sld [smem:[#allocation5_spill]] }
 0x112   : > { %p14_p7 = scmp.ge.s32.totalorder %s17_s22, 6   ;;  %s1020_s15 = smov %s798_s16 }
 0x113   : > { %s1021_s16 = smov %s802_s17  ;;  %s1022_s17 = smov %s921_s7 }
 0x114   : > { %s1023_s18 = smov %s814_s20  ;;  %s1024_s19 = smov %s818_s21 }
 0x115   : > { %s1025_s20 = smov %s1028_s25  ;;  %16 = sbr.rel (!%p14_p7) target bundleno = 5 (0x5), region = 76 }
 0x117   : > { %s1026_s21 = smov %s1019_s28 }
 0x11c   :  { %535 = vsyncpa [#allocation3], 1 }
 0x11d   :  { %537 = vsyncpa [#allocation3 + $0x1], 1 }

</bundles_post_ra>
